<compile_context>
chip_gen: v6e
topology: v6e:2x2x1
jax: 0.10.0
libtpu: 0.0.40
codegen_flags: <defaults>
</compile_context>

<pallas_src>
import functools

import jax
import jax.numpy as jnp
import numpy as np
from jax.experimental import pallas as pl
from jax.experimental.pallas import tpu as pltpu

N_HARMONIC = 10          # n_harmonic_functions
APPEND_INPUT = True


def pose_embedding_out_dim(target_dim: int) -> int:
    return target_dim * (2 * N_HARMONIC + int(APPEND_INPUT))


def _round_up(x: int, m: int) -> int:
    return ((x + m - 1) // m) * m


def _harmonic_kernel(x_ref, g_ref, o_ref, *, d: int):
    # x_ref: (TM, D)          tile of flattened pose encodings (f32)
    # g_ref: (D, D*N)         constant bf16 operand, G[j, j*N + k] = 2**k
    # o_ref: (TM, D*(2N+1))   output tile
    dn = d * N_HARMONIC
    x = x_ref[...]

    # Exact 3-way bf16 split of x: hi + mid + lo == x bit-exactly, and every part
    # is bf16-representable, so the bf16 matmuls below introduce no rounding.
    hi_b = x.astype(jnp.bfloat16)
    r1 = x - hi_b.astype(jnp.float32)
    mid_b = r1.astype(jnp.bfloat16)
    lo_b = (r1 - mid_b.astype(jnp.float32)).astype(jnp.bfloat16)

    g = g_ref[...]
    # Each G column has a single nonzero (an exact power of two), so each product
    # and each f32 partial sum is exact: embed == fl32(x * 2**k) bit-for-bit.
    # The MXU does the replication + scaling; the VPU/XLU no longer pay for the
    # non-view (TM, D, N) -> (TM, D*N) reshape.
    embed = (jnp.dot(hi_b, g, preferred_element_type=jnp.float32)
             + jnp.dot(mid_b, g, preferred_element_type=jnp.float32)
             + jnp.dot(lo_b, g, preferred_element_type=jnp.float32))  # (TM, D*N)

    # Direct slice stores into the output ref (no concatenate copy in VMEM).
    o_ref[:, 0:dn] = jnp.sin(embed)
    o_ref[:, dn:2 * dn] = jnp.cos(embed)
    if APPEND_INPUT:
        o_ref[:, 2 * dn:2 * dn + d] = x


def pose_embedding(pose_encoding: jax.Array, *, row_tile: int = 3072) -> jax.Array:
    """Pallas implementation of PoseEmbedding.forward (channels-last output)."""
    orig_shape = pose_encoding.shape
    d = int(orig_shape[-1])
    dn = d * N_HARMONIC
    out_dim = pose_embedding_out_dim(d)

    x2d = pose_encoding.reshape(-1, d).astype(jnp.float32)
    n_rows = x2d.shape[0]

    # Tile sizing:
    #  * large tiles (~2 MB of output/step at 3072 rows) -> HBM roofline on
    #    v5e/v6e and amortize the ~0.35us per-step overhead;
    #  * cap at ceil(n_rows/2) so the "parallel" grid has >= 2 steps and both
    #    v7x TensorCores get work;
    #  * VMEM at tile=3072: 2x~2.0 MB out + 2x~1.6 MB in (the (tile, 8) input
    #    block pads 8 lanes to 128 in VMEM) ~= 7 MB.  Don't grow past ~8k rows.
    tile = min(_round_up(row_tile, 8), _round_up(pl.cdiv(n_rows, 2), 8))
    tile = max(tile, 8)
    grid = (pl.cdiv(n_rows, tile),)

    # Trace-time constant operand: G[j, j*N + k] = 2**k (exact in bf16).
    g_np = np.zeros((d, dn), dtype=np.float32)
    for j in range(d):
        g_np[j, j * N_HARMONIC:(j + 1) * N_HARMONIC] = 2.0 ** np.arange(
            N_HARMONIC, dtype=np.float32)
    g = jnp.asarray(g_np, dtype=jnp.bfloat16)

    kernel = functools.partial(_harmonic_kernel, d=d)

    cost = pl.CostEstimate(
        flops=2 * n_rows * (3 * d) * dn + 6 * n_rows * d,
        transcendentals=2 * n_rows * dn,
        bytes_accessed=4 * n_rows * (d + out_dim) + 2 * d * dn,
    )

    out = pl.pallas_call(
        kernel,
        out_shape=jax.ShapeDtypeStruct((n_rows, out_dim), jnp.float32),
        grid_spec=pltpu.PrefetchScalarGridSpec(
            num_scalar_prefetch=0,
            grid=grid,
            in_specs=[
                pl.BlockSpec((tile, d), lambda i: (i, 0)),
                pl.BlockSpec((d, dn), lambda i: (0, 0)),   # constant block, no re-DMA
            ],
            out_specs=pl.BlockSpec((tile, out_dim), lambda i: (i, 0)),
        ),
        compiler_params=pltpu.CompilerParams(
            dimension_semantics=("parallel",),
        ),
        cost_estimate=cost,
    )(x2d, g)

    return out.reshape(*orig_shape[:-1], out_dim)


if __name__ == "__main__":
    # Small shapes consistent with the module: pose_encoding (B, S, target_dim).
    B, S, D = 2, 8, 8   # target_dim = 8 -> out_dim = 8 * 21 = 168
    key = jax.random.PRNGKey(0)
    pose_encoding = jax.random.normal(key, (B, S, D), dtype=jnp.float32)

    out = jax.block_until_ready(pose_embedding(pose_encoding))
    assert out.shape == (B, S, pose_embedding_out_dim(D)), out.shape
    out_np = np.asarray(out, dtype=np.float64)

    # Ground-truth reference in float64.  The kernel's sin/cos arguments are
    # bit-exact f32 (power-of-two scaling of an f32 input), so the only slack
    # needed is for f32 sin/cos range reduction of large arguments (|x| * 2**9):
    # allow a few ulps of the argument, tight 1e-5 elsewhere.
    x64 = np.asarray(pose_encoding, dtype=np.float64)
    freqs64 = 2.0 ** np.arange(N_HARMONIC, dtype=np.float64)
    embed64 = (x64[..., None] * freqs64).reshape(B, S, D * N_HARMONIC)
    ref = np.concatenate([np.sin(embed64), np.cos(embed64), x64], axis=-1)

    arg_mag = np.concatenate(
        [np.abs(embed64), np.abs(embed64), np.zeros_like(x64)], axis=-1)
    tol = 1e-5 + 4.0 * float(np.finfo(np.float32).eps) * arg_mag
    err = np.abs(out_np - ref)
    assert (err <= tol).all(), f"max excess error {float(np.max(err - tol)):.3e}"

    # Appended-input block must be an exact pass-through.
    dn = D * N_HARMONIC
    np.testing.assert_array_equal(np.asarray(out)[..., 2 * dn:],
                                  np.asarray(pose_encoding))

    print("KERNEL_OK")
</pallas_src>

<mosaic_0001>
module attributes {stable_mosaic.version = 11 : i64} {
  func.func @_harmonic_kernel(%arg0: i32, %arg1: memref<8x8xf32, #tpu.memory_space<vmem>>, %arg2: memref<8x80xbf16, #tpu.memory_space<vmem>>, %arg3: memref<8x168xf32, #tpu.memory_space<vmem>>) attributes {dimension_semantics = [#tpu.dimension_semantics<parallel>], iteration_bounds = array<i64: 2>, scalar_prefetch = 0 : i64, scratch_operands = 0 : i64, tpu.core_type = #tpu.core_type<tc>, window_params = [{transform_indices = @transform_0, window_bounds = array<i64: 8, 8>}, {pipeline_mode = #tpu.pipeline_mode<synchronous>, transform_indices = @transform_1, window_bounds = array<i64: 8, 80>}, {transform_indices = @transform_2, window_bounds = array<i64: 8, 168>}]} {
    %c0 = arith.constant 0 : index
    %c0_0 = arith.constant 0 : index
    %0 = vector.load %arg1[%c0, %c0_0] : memref<8x8xf32, #tpu.memory_space<vmem>>, vector<8x8xf32>
    %1 = arith.truncf %0 : vector<8x8xf32> to vector<8x8xbf16>
    %2 = arith.extf %1 : vector<8x8xbf16> to vector<8x8xf32>
    %3 = arith.subf %0, %2 : vector<8x8xf32>
    %4 = arith.truncf %3 : vector<8x8xf32> to vector<8x8xbf16>
    %5 = arith.extf %4 : vector<8x8xbf16> to vector<8x8xf32>
    %6 = arith.subf %3, %5 : vector<8x8xf32>
    %7 = arith.truncf %6 : vector<8x8xf32> to vector<8x8xbf16>
    %c0_1 = arith.constant 0 : index
    %c0_2 = arith.constant 0 : index
    %8 = vector.load %arg2[%c0_1, %c0_2] : memref<8x80xbf16, #tpu.memory_space<vmem>>, vector<8x80xbf16>
    %cst = arith.constant dense<0.000000e+00> : vector<8x80xf32>
    %9 = tpu.matmul %1, %8, %cst {dimension_numbers = #tpu.dot_dimension_numbers<[1], [0], [0], [1], [0, 0, 1, 1], [], []>} : vector<8x8xbf16>, vector<8x80xbf16>, vector<8x80xf32> -> vector<8x80xf32>
    %cst_3 = arith.constant dense<0.000000e+00> : vector<8x80xf32>
    %10 = tpu.matmul %4, %8, %cst_3 {dimension_numbers = #tpu.dot_dimension_numbers<[1], [0], [0], [1], [0, 0, 1, 1], [], []>} : vector<8x8xbf16>, vector<8x80xbf16>, vector<8x80xf32> -> vector<8x80xf32>
    %11 = arith.addf %9, %10 : vector<8x80xf32>
    %cst_4 = arith.constant dense<0.000000e+00> : vector<8x80xf32>
    %12 = tpu.matmul %7, %8, %cst_4 {dimension_numbers = #tpu.dot_dimension_numbers<[1], [0], [0], [1], [0, 0, 1, 1], [], []>} : vector<8x8xbf16>, vector<8x80xbf16>, vector<8x80xf32> -> vector<8x80xf32>
    %13 = arith.addf %11, %12 : vector<8x80xf32>
    %14 = math.sin %13 : vector<8x80xf32>
    %c0_5 = arith.constant 0 : index
    %c0_6 = arith.constant 0 : index
    %15 = vector.load %arg3[%c0_5, %c0_6] : memref<8x168xf32, #tpu.memory_space<vmem>>, vector<8x80xf32>
    tpu.vector_store %arg3[%c0_5, %c0_6], %14 {strides = array<i32>} : memref<8x168xf32, #tpu.memory_space<vmem>>, vector<8x80xf32>,
    %16 = math.cos %13 : vector<8x80xf32>
    %c0_7 = arith.constant 0 : index
    %c80 = arith.constant 80 : index
    %17 = vector.load %arg3[%c0_7, %c80] : memref<8x168xf32, #tpu.memory_space<vmem>>, vector<8x80xf32>
    tpu.vector_store %arg3[%c0_7, %c80], %16 {strides = array<i32>} : memref<8x168xf32, #tpu.memory_space<vmem>>, vector<8x80xf32>,
    %c0_8 = arith.constant 0 : index
    %c160 = arith.constant 160 : index
    %18 = vector.load %arg3[%c0_8, %c160] : memref<8x168xf32, #tpu.memory_space<vmem>>, vector<8x8xf32>
    tpu.vector_store %arg3[%c0_8, %c160], %0 {strides = array<i32>} : memref<8x168xf32, #tpu.memory_space<vmem>>, vector<8x8xf32>,
    return
  }
  func.func @transform_0(%arg0: i32) -> (i32, i32) {
    %c0_i32 = arith.constant 0 : i32
    %c0_i32_0 = arith.constant 0 : i32
    return %arg0, %c0_i32 : i32, i32
  }
  func.func @transform_1(%arg0: i32) -> (i32, i32) {
    %c0_i32 = arith.constant 0 : i32
    %c0_i32_0 = arith.constant 0 : i32
    %c0_i32_1 = arith.constant 0 : i32
    return %c0_i32, %c0_i32_0 : i32, i32
  }
  func.func @transform_2(%arg0: i32) -> (i32, i32) {
    %c0_i32 = arith.constant 0 : i32
    %c0_i32_0 = arith.constant 0 : i32
    return %arg0, %c0_i32 : i32, i32
  }
}

</mosaic_0001>

<bundles_post_ra>
// kernel: tpu_custom_call.1
= control target key start
LH: loop header
LB: loop body
LE: loop exit
PB: predicated region body
PF: predicated region fallthrough
CT: control target
= control target key end

     0   :  { %7 = vsyncpa [#allocation3], 0  ;;  %s904_s0 = inlined_call_operand.vmem [shape: f32[16,8], index: 0, kind: input, shape index: {}]   ;;  %s905_s1 = inlined_call_operand.vmem [shape: bf16[8,80], index: 1, kind: input, shape index: {}]   ;;  %s906_s2 = inlined_call_operand.hbm [shape: f32[16,168], index: 2, kind: output, shape index: {}]  }
   0x1   :  { %9 = vsyncpa [#allocation3 + $0x1], 0  ;;  %s773_s9 = smov 0   ;;  %s775_s10 = smov 0  }
   0x2   :  { %s777_s11 = smov 0   ;;  %s779_s12 = smov 0  }
   0x3 LB: > { %s794_s13 = sadd.s32 4294967295, %s745_s12   ;;  %s581_s14 = sadd.s32 4294967294, %s745_s12   ;;  %s745_s12 = sphi %s779_s12, %s912_s12   ;;  %s741_s11 = sphi %s777_s11, %s911_s11   ;;  %s737_s10 = sphi %s775_s10, %s910_s10   ;;  %s733_s9 = sphi %s773_s9, %s909_s9  }
   0x4   : > { %s798_s15 = sadd.s32 1, %s745_s12   ;;  %s69_s16 = sadd.s32 1, %s741_s11 }
   0x5   : > { %s66_s17 = ssub.s32 %s745_s12, %s798_s15  ;;  %p79_p0 = scmp.ne.s32.totalorder %s741_s11, %s737_s10 }
   0x6   : > { %p67_p1 = scmp.eq.s32.totalorder %s66_s17, 0  ;;  %p80_p2 = scmp.eq.s32.totalorder %s794_s13, 1 }
   0x7   : > { %p85_p3 = scmp.ne.s32.totalorder %s737_s10, %s733_s9  ;;  %p86_p4 = scmp.eq.s32.totalorder %s581_s14, 1 }
   0x8   : > { %s809_s18 = scalar_select %p67_p1, %s741_s11, %s69_s16  }
   0x9   : > { %p811_p5 = por %p80_p2, %p79_p0  ;;  %p815_p6 = por %p86_p4, %p85_p3 }
   0xa   : > { %p584_p7 = scmp.ge.s32.totalorder %s745_s12, 1  ;;  %p114_p8 = scmp.lt.s32.totalorder %s745_s12, 3 }
   0xc   : > { %p115_p9 = pnand %p584_p7, %p114_p8 }
   0xd   : > { %p135_p10 = scmp.lt.s32.totalorder (!%p115_p9), %s794_s13, 1  ;;  %s132_s28 = sand.u32 (!%p115_p9), 1, %s737_s10  }
   0xe   : > { %118 = sbr.rel (%p115_p9) target bundleno = 449 (0x1c1), region = 28  ;;  %s585_s29 = sshll.u32 (!%p115_p9), %s132_s28, 4 }
   0xf   : > { %s755_s30 = smov (!%p115_p9), 80   ;;  %s134_s3 = scalar_lea.vmem (!%p115_p9), [#allocation2], %s585_s29 }
  0x10   : > { %s756_s4 = smov (!%p115_p9), 32   ;;  %s603_s5 = sshll.u32 (!%p115_p9), %s794_s13, 8 }
  0x11   : > { %s522_s6 = sshll.u32 (!%p115_p9), %s134_s3, 4  ;;  %s867_s14 = scalar_lea.hbm (!%p115_p9), %s906_s2, %s603_s5  ;;  %s523_s6 = int_to_ptr.vmem [resolvable:$true] %s522_s6 }
  0x12   : > { %s508_s16 = scalar_lea.sflag (!%p115_p9), [#allocation3], %s132_s28  ;;  %s685_s17 = scalar_lea.vmem (!%p115_p9), %s523_s6, 256 }
  0x13   : > { %v148_v0 = vld [vmem:[%s905_s1] sm:$0xf]  ;;  %vm153_vm0 = vcmask 1043456   ;;  %v747_v1 = vmov 0.0   ;;  %s136_s23 = scalar_select %p135_p10, %s794_s13, 1  ;;  %vm748_vm1 = vmmov 0  }
  0x14   : > { %610 = vmatprep.subr.bf16.mxu0 %v747_v1  ;;  %v155_v2 = vsel %vm153_vm0, %v148_v0, 0  ;;  %616 = vmatprep.subr.bf16.mxu1 %v747_v1  ;;  %vm149_vm2 = vcmask 64512   ;;  %v749_v36 = vmov 2102212464   ;;  %v750_v38 = vmov 920167782   ;;  %p686_p11 = scmp.ne.s32.totalorder %s523_s6, %s685_s17 }
  0x15   : > { %611 = vmatpush3.bf16.msra.mxu0 %v155_v2  ;;  %617 = vmatpush3.bf16.msra.mxu1 %v155_v2  ;;  %s586_s24 = sshll.u32 %s136_s23, 3  ;;  %v751_v42 = vmov 1326507024   ;;  %v752_v44 = vmov 683565275   ;;  %vm388_vm13 = vcmask 654336  }
  0x16   : > { %612 = vmatprep.mubr.msk.bf16.mxu0 %vm748_vm1, %v747_v1  ;;  %618 = vmatprep.mubr.msk.bf16.mxu1 %vm748_vm1, %v747_v1  ;;  %s138_s27 = scalar_lea.vmem %s904_s0, %s586_s24  ;;  %v753_v46 = vmov 2475754826   ;;  %v754_v49 = vmov 2131351028   ;;  %p687_p12 = pnand %p686_p11, %p811_p5 }
  0x17   : > { %622 = vmatprep.subr.bf16.mxu0 %v747_v1  ;;  %v831_v3 = vld [vmem:[%s138_s27] sm:$0xff]  ;;  %s757_s13 = smov [#allocation2]  }
  0x18   : > { %v141_v4 = vpack.c.bf16 %v831_v3, %v831_v3  ;;  %p688_p13 = pneg %p687_p12  ;;  %s689_s21 = sshll.u32 %s757_s13, 4  ;;  %s690_s21 = int_to_ptr.vmem [resolvable:$false] %s689_s21 }
  0x19   : > { %s691_s22 = scalar_lea.vmem %s690_s21, 512  ;;  %p692_p0 = scmp.lt.s32.totalorder %s523_s6, %s690_s21 }
  0x1a   : > { %v142_v5 = vunpack.c.l.bf16 %v141_v4  ;;  %619 = vmatmul.mubr.msk.bf16.vlgmr.msra.gmra.mxu1 %vm149_vm2, %v141_v4  ;;  %p693_p1 = scmp.lt.s32.totalorder %s691_s22, %s685_s17 }
  0x1c   : > { %v143_v6 = vsub.f32 %v831_v3, %v142_v5  ;;  %p694_p2 = por %p693_p1, %p692_p0 }
  0x1e   : > { %v144_v7 = vpack.c.bf16 %v143_v6, %v143_v6  ;;  %p695_p3 = pnand %p694_p2, %p688_p13 }
  0x20   : > { %v145_v8 = vunpack.c.l.bf16 %v144_v7  ;;  %613 = vmatmul.mubr.msk.bf16.vlgmr.msra.gmra.mxu0 %vm149_vm2, %v144_v7 }
  0x21   : > { %623 = vmatpush3.bf16.msra.mxu0 %v155_v2  ;;  %624 = vmatprep.mubr.msk.bf16.mxu0 %vm748_vm1, %v747_v1 }
  0x22   : > { %v146_v9 = vsub.f32 %v143_v6, %v145_v8 }
  0x24   : > { %v147_v10 = vpack.c.bf16 %v146_v9, %v146_v9 }
  0x28   : > { %625 = vmatmul.mubr.msk.bf16.vlgmr.msra.gmra.mxu0 %vm149_vm2, %v147_v10 }
  0xda   : > { %v234_v11 = vpop.f32.mrf.mxu1 }
  0xdc   : > { %v620_v12 = vpop.f32.mrf.mxu1 }
  0xde   : > { %v237_v13 = vpop.f32.mrf.mxu1 }
  0xe0   : > { %v191_v14 = vpop.f32.mrf.mxu0  ;;  %v621_v15 = vpop.f32.mrf.mxu1 }
  0xe1   : > { %v235_v19 = vadd.f32 %v234_v11, %v191_v14 }
  0xe2   : > { %v614_v16 = vpop.f32.mrf.mxu0 }
  0xe4   : > { %v194_v17 = vpop.f32.mrf.mxu0 }
  0xe6   : > { %v615_v18 = vpop.f32.mrf.mxu0 }
  0xe8   : > { %v277_v20 = vpop.f32.mrf.mxu0 }
  0xe9   : > { %v837_v21 = vadd.f32 %v277_v20, %v235_v19 }
  0xea   : > { %v626_v22 = vpop.f32.mrf.mxu0 }
  0xeb   : > { %v287_v23 = vand.u32 2139095040, %v837_v21  ;;  %v284_v25 = vand.u32 2147483647, %v837_v21  ;;  %vm286_vm10 = vcmp.lt.s32.totalorder %v837_v21, 0 }
  0xec   : > { %v280_v24 = vpop.f32.mrf.mxu0 }
  0xed   : > { %v288_v26 = vshrl.u32 %v287_v23, 23  ;;  %v291_v29 = vand.u32 8388607, %v284_v25  ;;  %vm285_vm11 = vcmp.le.f32.partialorder %v284_v25, 0.7853982 }
  0xee   : > { %v627_v27 = vpop.f32.mrf.mxu0 }
  0xef   : > { %v590_v28 = vadd.s32 4294967169, %v288_v26  ;;  %v292_v32 = vor.u32 8388608, %v291_v29 }
  0xf1   : > { %v294_v30 = vadd.s32 1, %v590_v28  ;;  %v332_v40 = vshll.u32 %v292_v32, 8 }
  0xf3   : > { %vm295_vm3 = vcmp.gt.s32.totalorder %v294_v30, 0 }
  0xf4   : > { %v296_v31 = vsel %vm295_vm3, %v294_v30, 0  ;;  %vm376_vm3 = vweird.f32 %v837_v21 }
  0xf5   : > { %v298_v33 = vand.u32 31, %v296_v31  ;;  %v297_v34 = vshrl.u32 %v296_v31, 5 }
  0xf7   : > { %v299_v35 = vsub.s32 32, %v298_v33  ;;  %v310_v37 = vshll.u32 %v749_v36, %v298_v33  ;;  %v313_v39 = vshll.u32 %v750_v38, %v298_v33  ;;  %v301_v45 = vshll.u32 %v752_v44, %v298_v33 }
  0xf8   : > { %v304_v48 = vshll.u32 %v753_v46, %v298_v33  ;;  %v307_v51 = vshll.u32 %v754_v49, %v298_v33  ;;  %vm319_vm4 = vcmp.lt.s32.totalorder %v297_v34, 4  ;;  %vm316_vm5 = vcmp.lt.s32.totalorder %v297_v34, 1 }
  0xf9   : > { %v311_v41 = vshrl.u32 %v750_v38, %v299_v35  ;;  %v314_v43 = vshrl.u32 %v751_v42, %v299_v35  ;;  %v302_v47 = vshrl.u32 %v753_v46, %v299_v35  ;;  %v305_v50 = vshrl.u32 %v754_v49, %v299_v35 }
  0xfa   : > { %v308_v52 = vshrl.u32 %v749_v36, %v299_v35  ;;  %v300_v56 = vshrl.u32 %v752_v44, %v299_v35  ;;  %vm317_vm6 = vcmp.lt.s32.totalorder %v297_v34, 2  ;;  %vm318_vm7 = vcmp.lt.s32.totalorder %v297_v34, 3 }
  0xfb   : > { %v312_v53 = vor.u32 %v311_v41, %v310_v37  ;;  %v315_v54 = vor.u32 %v314_v43, %v313_v39  ;;  %v303_v55 = vor.u32 %v302_v47, %v301_v45  ;;  %v306_v57 = vor.u32 %v305_v50, %v304_v48 }
  0xfc   : > { %v309_v58 = vor.u32 %v308_v52, %v307_v51 }
  0xfd   : > { %v325_v59 = vsel %vm319_vm4, %v312_v53, 920167782  ;;  %v329_v60 = vsel %vm319_vm4, %v315_v54, 1326507024  ;;  %v324_v62 = vsel %vm316_vm5, %v303_v55, %v306_v57  ;;  %v320_v1 = vsel %vm316_vm5, %v300_v56, %v303_v55 }
  0xfe   : > { %v321_v61 = vsel %vm319_vm4, %v309_v58, 2102212464  ;;  %v326_v63 = vsel %vm318_vm7, %v309_v58, %v325_v59  ;;  %v328_v0 = vsel %vm316_vm5, %v306_v57, %v309_v58  ;;  %v330_v5 = vsel %vm318_vm7, %v312_v53, %v329_v60 }
  0xff   : > { %v322_v2 = vsel %vm318_vm7, %v306_v57, %v321_v61  ;;  %v327_v4 = vsel %vm317_vm6, %v324_v62, %v326_v63  ;;  %v331_v6 = vsel %vm317_vm6, %v328_v0, %v330_v5  ;;  %vm497_vm4 = vcmask 1048192  }
 0x100   : > { %v843_v7 = vmul.u32.u64.low %v332_v40, %v327_v4  ;;  %v844_v8 = vmul.u32.u64.high %v332_v40, %v327_v4, %v843_v7  ;;  %v846_v9 = vmul.u32.u64.low %v332_v40, %v331_v6  ;;  %v847_v10 = vmul.u32.u64.high %v332_v40, %v331_v6, %v846_v9 }
 0x101   : > { %v323_v11 = vsel %vm317_vm6, %v320_v1, %v322_v2  ;;  %vm499_vm5 = vcmask 261120   ;;  %vm505_vm6 = vcmask 326912  }
 0x102   : > { %v342_v12 = vadd.s32 1, %v844_v8  ;;  %v339_v13 = vmul.u32 %v332_v40, %v323_v11  ;;  %vm341_vm8 = vc.u32 %v847_v10, %v843_v7  ;;  %v340_v27 = vadd.s32 %v843_v7, %v847_v10 }
 0x104   : > { %v343_v14 = vsel %vm341_vm8, %v342_v12, %v844_v8 }
 0x105   : > { %v344_v15 = vadd.s32 %v343_v14, %v339_v13 }
 0x107   : > { %v345_v16 = vadd.s32 536870912, %v344_v15 }
 0x109   : > { %v346_v17 = vshrl.u32 %v345_v16, 30 }
 0x10b   : > { %v347_v18 = vshll.u32 %v346_v17, 30  ;;  %v370_v40 = vsub.s32 4, %v346_v17 }
 0x10d   : > { %v348_v19 = vsub.s32 %v344_v15, %v347_v18  ;;  %v371_v43 = vsel %vm286_vm10, %v370_v40, %v346_v17 }
 0x10e   : > { %v373_v44 = vsel %vm285_vm11, 0, %v371_v43 }
 0x10f   : > { %v350_v20 = vsub.s32 0, %v348_v19  ;;  %v377_v45 = vadd.s32 3, %v373_v44  ;;  %v483_v47 = vand.u32 3, %v373_v44 }
 0x111   : > { %v591_v22 = vmin.u32 %v350_v20, %v348_v19  ;;  %v378_v46 = vand.u32 3, %v377_v45  ;;  %vm488_vm14 = vcmp.eq.s32.totalorder %v483_v47, 2  ;;  %vm485_vm0 = vcmp.eq.s32.totalorder %v483_v47, 0 }
 0x112   : > { %vm484_vm2 = vcmp.lt.s32.totalorder %v483_v47, 2 }
 0x113   : > { %v352_v23 = vclz %v591_v22  ;;  %vm383_vm12 = vcmp.eq.s32.totalorder %v378_v46, 2  ;;  %vm380_vm15 = vcmp.eq.s32.totalorder %v378_v46, 0  ;;  %vm379_vm1 = vcmp.lt.s32.totalorder %v378_v46, 2 }
 0x115   : > { %v592_v24 = vadd.s32 4294967294, %v352_v23 }
 0x117   : > { %vm593_vm9 = vcmp.lt.s32.totalorder %v592_v24, 0 }
 0x118   : > { %v355_v26 = vsel %vm593_vm9, 0, %v592_v24 }
 0x119   : > { %v356_v28 = vsub.s32 32, %v355_v26  ;;  %v360_v29 = vsub.s32 4294967266, %v355_v26  ;;  %v357_v30 = vshll.u32 %v348_v19, %v355_v26 }
 0x11b   : > { %v358_v31 = vshrl.u32 %v340_v27, %v356_v28  ;;  %v361_v32 = vadd.s32 127, %v360_v29 }
 0x11d   : > { %v359_v33 = vor.u32 %v358_v31, %v357_v30  ;;  %v362_v34 = vshll.u32 %v361_v32, 23 }
 0x11f   : > { %v363_v35 = vor.u32 4788187, %v362_v34  ;;  %v366_v37 = vcvt.s32.f32 %v359_v33 }
 0x121   : > { %v364_v36 = vand.u32 2147483647, %v363_v35 }
 0x123   : > { %v367_v38 = vmul.f32 %v366_v37, %v364_v36 }
 0x125   : > { %v368_v39 = vxor.u32 2147483648, %v367_v38 }
 0x127   : > { %v369_v41 = vsel %vm286_vm10, %v368_v39, %v367_v38 }
 0x128   : > { %v372_v42 = vsel %vm285_vm11, %v837_v21, %v369_v41 }
 0x129   : > { %681 = vcosq.f32 %v372_v42 }
 0x12a   : > { %683 = vsinq.f32 %v372_v42 }
 0x136   : > { %v682_v48 = vpop.eup %681 }
 0x137   : > { %v684_v49 = vpop.eup %683  ;;  %v384_v50 = vxor.u32 2147483648, %v682_v48 }
 0x138   : > { %v381_v51 = vxor.u32 2147483648, %v684_v49 }
 0x139   : > { %v490_v25 = vsel %vm488_vm14, %v384_v50, %v684_v49  ;;  %v385_v52 = vsel %vm383_vm12, %v384_v50, %v684_v49 }
 0x13a   : > { %v487_v53 = vsel %vm485_vm0, %v682_v48, %v381_v51  ;;  %v382_v54 = vsel %vm380_vm15, %v682_v48, %v381_v51 }
 0x13b   : > { %v491_v55 = vsel %vm484_vm2, %v487_v53, %v490_v25  ;;  %v386_v56 = vsel %vm379_vm1, %v382_v54, %v385_v52 }
 0x13c   : > { %v492_v57 = vsel %vm376_vm3, nan, %v491_v55  ;;  %v387_v58 = vsel %vm376_vm3, nan, %v386_v56 }
 0x13d   : > { %494 = vrot.lane.b32.xlu0 %v492_v57, %s755_s30  ;;  %389 = vst.msk [vmem:[%s134_s3] sm:$0xff] %vm388_vm13, %v387_v58 }
 0x141   : > { %502 = vrot.lane.b32.xlu0 %v831_v3, %s756_s4 }
 0x1af   : > { %v495_v59 = vpop.permute.xlu0 %494 }
 0x1b0   : > { %498 = vst.msk [vmem:[%s134_s3] sm:$0xff] %vm497_vm4, %v495_v59 }
 0x1b1   : > { %500 = vst.msk [vmem:[%s134_s3 + $0x8] sm:$0xff] %vm499_vm5, %v495_v59 }
 0x1b3   : > { %v503_v21 = vpop.permute.xlu0 %502 }
 0x1b4   : > { %506 = vst.msk [vmem:[%s134_s3 + $0x8] sm:$0xff] %vm505_vm6, %v503_v21 }
 0x1b5   : > { %698 = shalt.err (!%p695_p3)
}
 0x1b6   : > { %s699_s23 = scalar_lea.hbm %s867_s14, 256  ;;  %s703_s26 = scalar_lea.hbm %s906_s2, 512 }
 0x1b7   : > { %p700_p4 = scmp.ne.s32.totalorder %s867_s14, %s699_s23  ;;  %p704_p9 = scmp.lt.s32.totalorder %s867_s14, %s906_s2 }
 0x1b8   : > { %p705_p10 = scmp.lt.s32.totalorder %s703_s26, %s699_s23 }
 0x1b9   : > { %p701_p7 = pnand %p700_p4, %p811_p5 }
 0x1ba   : > { %p706_p11 = por %p705_p10, %p704_p9 }
 0x1bb   : > { %p702_p8 = pneg %p701_p7 }
 0x1bd   : > { %p707_p12 = pnand %p706_p11, %p702_p8 }
 0x1bf   : > { %710 = shalt.err (!%p707_p12)
}
 0x1c0   : > { %632 = dma.vmem_to_hbm [thread:$0]  (%p811_p5), %s523_s6, 256, %s867_s14, %s508_s16  }
 0x1c1 PF: > { %p638_p13 = scmp.ge.s32.totalorder %s745_s12, 2  ;;  %s534_s29 = sand.u32 1, %s733_s9  }
 0x1c2   : > { %s535_s30 = scalar_lea.sflag [#allocation3], %s534_s29 }
 0x1c3   : > { %p635_p0 = pnand %p638_p13, %p815_p6 }
 0x1c5   : > { %p636_p1 = pneg %p635_p0 }
 0x1c7   : > { %728 = dma.done.wait (%p636_p1), %s535_s30, 256  }
 0x1c8   : > { %730 = vsyncadd (%p636_p1), %s535_s30, 4294967040  ;;  %p12_p2 = scmp.ge.s32.totalorder %s798_s15, 4   ;;  %s909_s9 = smov %s737_s10 }
 0x1c9   : > { %s910_s10 = smov %s741_s11  ;;  %s911_s11 = smov %s809_s18 }
 0x1ca   : > { %s912_s12 = smov %s798_s15  ;;  %14 = sbr.rel (!%p12_p2) target bundleno = 3 (0x3), region = 63 }
 0x1cf   :  { %540 = vsyncpa [#allocation3], 1 }
 0x1d0   :  { %542 = vsyncpa [#allocation3 + $0x1], 1 }

</bundles_post_ra>
